<compile_context>
chip_gen: v5e
topology: v5e:2x2
jax: 0.10.0
libtpu: 0.0.40
codegen_flags: <defaults>
</compile_context>

<pallas_src>
import jax
import jax.numpy as jnp
from jax.experimental import pallas as pl
from jax.experimental.pallas import tpu as pltpu


def merge_layer_kernel(x1_ref, x2_ref, w1a_ref, w1b_ref, b1_ref, w2_ref, b2_ref,
                       out_ref):
    # fc1 as two partial dots (replaces concat + single dot), f32 accumulation.
    h = jnp.dot(x1_ref[...], w1a_ref[...], preferred_element_type=jnp.float32)
    h = h + jnp.dot(x2_ref[...], w1b_ref[...], preferred_element_type=jnp.float32)
    h = jnp.maximum(h + b1_ref[...], 0.0)                      # bias + ReLU
    # fc2 (h stays in VMEM/vregs; no lane padding of the hidden dim needed).
    y = jnp.dot(h.astype(w2_ref.dtype), w2_ref[...],
                preferred_element_type=jnp.float32) + b2_ref[...]
    out_ref[...] = y.astype(out_ref.dtype)


def _round_up(n, m):
    return ((n + m - 1) // m) * m


def _tpu_generation():
    try:
        kind = jax.devices()[0].device_kind.lower()
    except Exception:
        return "unknown"
    if "v7" in kind:
        return "v7"
    if "v6" in kind:
        return "v6"
    if "v5" in kind:
        return "v5"
    return "unknown"


# (batch-tile VMEM budget, max batch tile rows, vmem_limit_bytes cap) per TC.
_GEN_PARAMS = {
    "v7":      (24 << 20, 512, 48 << 20),    # 64 MiB phys / 32 MiB scoped per TC
    "v6":      (64 << 20, 2048, 112 << 20),  # 128 MiB phys, single TC
    "v5":      (48 << 20, 1024, 112 << 20),  # 128 MiB phys (16 MiB scoped default)
    "unknown": (24 << 20, 512, 48 << 20),    # conservative fallback
}


def _vmem_estimate(TB, d1, d2, d3, d4_out, in_itemsize):
    """Conservative VMEM use: double-buffered resident weights + streamed tiles + h."""
    resident = 2 * (((d1 + d2) * d3 + d3 * d4_out) * in_itemsize
                    + (d3 + d4_out) * 4)                      # biases stay f32
    per_row = (2 * (d1 + d2) * in_itemsize                    # x1/x2, double-buffered
               + 2 * d4_out * 4                               # output, ALWAYS f32
               + d3 * 4)                                      # f32 intermediate h
    return resident, per_row, resident + TB * per_row


def _pick_block_b(B, d1, d2, d3, d4_out, in_itemsize, budget_bytes, max_block_b):
    resident, per_row, _ = _vmem_estimate(0, d1, d2, d3, d4_out, in_itemsize)
    tb = (budget_bytes - resident) // max(per_row, 1)
    tb = max(8, min(tb, max_block_b))
    tb = (tb // 8) * 8                                        # sublane multiple
    return min(tb, _round_up(B, 8))                           # don't exceed padded batch


def merge_layer(x1, x2, w1_t, b1, w2_t, b2, *, block_b=None, lane=128,
                use_bf16=False):
    """x1:[B,d1] x2:[B,d2] w1_t:[d1+d2,d3] b1:[1,d3] w2_t:[d3,d4] b2:[1,d4] -> [B,d4]"""
    B, d1 = x1.shape
    d2 = x2.shape[1]
    d3 = w1_t.shape[1]
    d4 = w2_t.shape[1]

    gen = _tpu_generation()
    budget, max_tb, vmem_cap = _GEN_PARAMS[gen]

    # Split fc1's weight along its input (concat) axis -> no in-kernel concat.
    w1a = w1_t[:d1, :]
    w1b = w1_t[d1:, :]

    # d3 is deliberately NOT padded (pure wasted MXU work + VMEM).
    # Pad d4 to a lane multiple only when inflation is modest (<= 2x).
    d4p = _round_up(d4, lane)
    d4_out = d4p if d4p <= 2 * d4 else d4
    if d4_out != d4:
        w2_t = jnp.pad(w2_t, ((0, 0), (0, d4_out - d4)))
        b2 = jnp.pad(b2, ((0, 0), (0, d4_out - d4)))

    in_itemsize = 2 if use_bf16 else 4
    TB = block_b if block_b is not None else _pick_block_b(
        B, d1, d2, d3, d4_out, in_itemsize, budget, max_tb)
    TB = max(8, (TB // 8) * 8)
    Bp = _round_up(B, TB)

    # v7x has 2 TensorCores: a single-step "parallel" grid idles half the chip.
    if gen == "v7" and Bp // TB < 2 and Bp >= 16:
        TB = max(8, ((Bp // 2) // 8) * 8)
        Bp = _round_up(B, TB)

    if Bp != B:
        x1 = jnp.pad(x1, ((0, Bp - B), (0, 0)))
        x2 = jnp.pad(x2, ((0, Bp - B), (0, 0)))

    if use_bf16:
        # TODO(synk): for compute-bound shapes cast at the producer (upstream),
        # not here — this wrapper astype is an extra HBM pass over the inputs.
        cast = lambda a: a.astype(jnp.bfloat16)
        x1, x2, w1a, w1b, w2_t = map(cast, (x1, x2, w1a, w1b, w2_t))

    grid = (Bp // TB,)

    def batch_spec(cols):
        return pl.BlockSpec((TB, cols), lambda i: (i, 0))

    def resident_spec(shape):
        # Constant block index -> weights stay VMEM-resident across grid steps.
        # (pl.Buffered(1) would halve their VMEM; we instead charge 2x in the
        #  budget/vmem_limit to stay conservative.)
        return pl.BlockSpec(shape, lambda i: (0, 0))

    # Honest scheduler hint: unpadded hidden dim, real output width.
    flops = 2 * Bp * (d1 + d2) * d3 + 2 * Bp * d3 * d4_out
    bytes_accessed = (
        Bp * (d1 + d2) * in_itemsize                     # x1, x2
        + ((d1 + d2) * d3 + d3 * d4_out) * in_itemsize   # weights
        + (d3 + d4_out) * 4                              # biases (f32)
        + Bp * d4_out * 4                                # output (f32)
    )

    # Enforceable, generation-aware VMEM limit covering the picker's assumptions.
    _, _, est_vmem = _vmem_estimate(TB, d1, d2, d3, d4_out, in_itemsize)
    vmem_limit = int(min(vmem_cap, max(32 << 20, int(est_vmem * 1.3) + (2 << 20))))

    out = pl.pallas_call(
        merge_layer_kernel,
        out_shape=jax.ShapeDtypeStruct((Bp, d4_out), jnp.float32),
        grid=grid,
        in_specs=[
            batch_spec(d1),
            batch_spec(d2),
            resident_spec(w1a.shape),
            resident_spec(w1b.shape),
            resident_spec(b1.shape),
            resident_spec(w2_t.shape),
            resident_spec(b2.shape),
        ],
        out_specs=batch_spec(d4_out),
        compiler_params=pltpu.CompilerParams(
            dimension_semantics=("parallel",),
            vmem_limit_bytes=vmem_limit),
        cost_estimate=pl.CostEstimate(flops=flops, transcendentals=0,
                                      bytes_accessed=bytes_accessed),
    )(x1, x2, w1a, w1b, b1, w2_t, b2)

    if Bp != B or d4_out != d4:
        out = out[:B, :d4]
    return out


def init_params(key, dim1, dim2, dim3, dim4):
    """Synthetic init mirroring the module: xavier_normal weights, uniform biases.

    fc1.weight: [dim3, dim1+dim2], fc1.bias: [dim3]
    fc2.weight: [dim4, dim3],      fc2.bias: [dim4]
    Returned pre-transposed to [in, out]; biases as [1, out].
    """
    k1, k2, k3, k4 = jax.random.split(key, 4)
    fan_in1, fan_out1 = dim1 + dim2, dim3
    std1 = (2.0 / (fan_in1 + fan_out1)) ** 0.5
    w1 = std1 * jax.random.normal(k1, (dim3, dim1 + dim2), dtype=jnp.float32)
    b1 = (1.0 / (fan_in1 ** 0.5)) * jax.random.uniform(
        k2, (dim3,), minval=-1.0, maxval=1.0, dtype=jnp.float32)

    fan_in2, fan_out2 = dim3, dim4
    std2 = (2.0 / (fan_in2 + fan_out2)) ** 0.5
    w2 = std2 * jax.random.normal(k3, (dim4, dim3), dtype=jnp.float32)
    b2 = (1.0 / (fan_in2 ** 0.5)) * jax.random.uniform(
        k4, (dim4,), minval=-1.0, maxval=1.0, dtype=jnp.float32)

    return w1.T, b1[None, :], w2.T, b2[None, :]


if __name__ == "__main__":
    # Shapes consistent with the module: x1:[B,dim1], x2:[B,dim2].
    # B=256 with block_b=128 exercises a 2-step batch grid.
    B, dim1, dim2, dim3, dim4 = 256, 32, 32, 64, 32

    key = jax.random.PRNGKey(0)
    kx1, kx2, kp = jax.random.split(key, 3)
    x1 = jax.random.normal(kx1, (B, dim1), dtype=jnp.float32)
    x2 = jax.random.normal(kx2, (B, dim2), dtype=jnp.float32)
    w1_t, b1, w2_t, b2 = init_params(kp, dim1, dim2, dim3, dim4)

    out = merge_layer(x1, x2, w1_t, b1, w2_t, b2, block_b=128)
    out = jax.block_until_ready(out)

    # Also exercise the auto tile picker once (same math, different TB).
    out2 = jax.block_until_ready(merge_layer(x1, x2, w1_t, b1, w2_t, b2))

    # Reference: same math as the PyTorch forward (concat -> fc1 -> ReLU -> fc2).
    x = jnp.concatenate([x1, x2], axis=1)
    ref = jnp.maximum(x @ w1_t + b1, 0.0) @ w2_t + b2
    assert out.shape == (B, dim4)
    assert jnp.allclose(out, ref, atol=1e-4, rtol=1e-4)
    assert jnp.allclose(out2, ref, atol=1e-4, rtol=1e-4)

    print("KERNEL_OK")
</pallas_src>

<mosaic_0001>
module attributes {stable_mosaic.version = 11 : i64} {
  func.func @merge_layer_kernel(%arg0: i32, %arg1: memref<128x32xf32, #tpu.memory_space<vmem>>, %arg2: memref<128x32xf32, #tpu.memory_space<vmem>>, %arg3: memref<32x64xf32, #tpu.memory_space<vmem>>, %arg4: memref<32x64xf32, #tpu.memory_space<vmem>>, %arg5: memref<1x64xf32, #tpu.memory_space<vmem>>, %arg6: memref<64x32xf32, #tpu.memory_space<vmem>>, %arg7: memref<1x32xf32, #tpu.memory_space<vmem>>, %arg8: memref<128x32xf32, #tpu.memory_space<vmem>>) attributes {dimension_semantics = [#tpu.dimension_semantics<parallel>], iteration_bounds = array<i64: 2>, scalar_prefetch = 0 : i64, scratch_operands = 0 : i64, tpu.core_type = #tpu.core_type<tc>, window_params = [{transform_indices = @transform_0, window_bounds = array<i64: 128, 32>}, {transform_indices = @transform_1, window_bounds = array<i64: 128, 32>}, {pipeline_mode = #tpu.pipeline_mode<synchronous>, transform_indices = @transform_2, window_bounds = array<i64: 32, 64>}, {pipeline_mode = #tpu.pipeline_mode<synchronous>, transform_indices = @transform_3, window_bounds = array<i64: 32, 64>}, {pipeline_mode = #tpu.pipeline_mode<synchronous>, transform_indices = @transform_4, window_bounds = array<i64: 1, 64>}, {pipeline_mode = #tpu.pipeline_mode<synchronous>, transform_indices = @transform_5, window_bounds = array<i64: 64, 32>}, {pipeline_mode = #tpu.pipeline_mode<synchronous>, transform_indices = @transform_6, window_bounds = array<i64: 1, 32>}, {transform_indices = @transform_7, window_bounds = array<i64: 128, 32>}]} {
    %c0 = arith.constant 0 : index
    %c0_0 = arith.constant 0 : index
    %0 = vector.load %arg1[%c0, %c0_0] : memref<128x32xf32, #tpu.memory_space<vmem>>, vector<128x32xf32>
    %c0_1 = arith.constant 0 : index
    %c0_2 = arith.constant 0 : index
    %1 = vector.load %arg3[%c0_1, %c0_2] : memref<32x64xf32, #tpu.memory_space<vmem>>, vector<32x64xf32>
    %cst = arith.constant dense<0.000000e+00> : vector<128x64xf32>
    %2 = tpu.matmul %0, %1, %cst {dimension_numbers = #tpu.dot_dimension_numbers<[1], [0], [0], [1], [0, 0, 1, 1], [], []>} : vector<128x32xf32>, vector<32x64xf32>, vector<128x64xf32> -> vector<128x64xf32>
    %c0_3 = arith.constant 0 : index
    %c0_4 = arith.constant 0 : index
    %3 = vector.load %arg2[%c0_3, %c0_4] : memref<128x32xf32, #tpu.memory_space<vmem>>, vector<128x32xf32>
    %c0_5 = arith.constant 0 : index
    %c0_6 = arith.constant 0 : index
    %4 = vector.load %arg4[%c0_5, %c0_6] : memref<32x64xf32, #tpu.memory_space<vmem>>, vector<32x64xf32>
    %cst_7 = arith.constant dense<0.000000e+00> : vector<128x64xf32>
    %5 = tpu.matmul %3, %4, %cst_7 {dimension_numbers = #tpu.dot_dimension_numbers<[1], [0], [0], [1], [0, 0, 1, 1], [], []>} : vector<128x32xf32>, vector<32x64xf32>, vector<128x64xf32> -> vector<128x64xf32>
    %6 = arith.addf %2, %5 : vector<128x64xf32>
    %c0_8 = arith.constant 0 : index
    %c0_9 = arith.constant 0 : index
    %7 = vector.load %arg5[%c0_8, %c0_9] : memref<1x64xf32, #tpu.memory_space<vmem>>, vector<1x64xf32>
    %8 = vector.broadcast %7 : vector<1x64xf32> to vector<128x64xf32>
    %9 = arith.addf %6, %8 : vector<128x64xf32>
    %cst_10 = arith.constant 0.000000e+00 : f32
    %10 = vector.broadcast %cst_10 : f32 to vector<128x64xf32>
    %11 = arith.maximumf %9, %10 : vector<128x64xf32>
    %c0_11 = arith.constant 0 : index
    %c0_12 = arith.constant 0 : index
    %12 = vector.load %arg6[%c0_11, %c0_12] : memref<64x32xf32, #tpu.memory_space<vmem>>, vector<64x32xf32>
    %cst_13 = arith.constant dense<0.000000e+00> : vector<128x32xf32>
    %13 = tpu.matmul %11, %12, %cst_13 {dimension_numbers = #tpu.dot_dimension_numbers<[1], [0], [0], [1], [0, 0, 1, 1], [], []>} : vector<128x64xf32>, vector<64x32xf32>, vector<128x32xf32> -> vector<128x32xf32>
    %c0_14 = arith.constant 0 : index
    %c0_15 = arith.constant 0 : index
    %14 = vector.load %arg7[%c0_14, %c0_15] : memref<1x32xf32, #tpu.memory_space<vmem>>, vector<1x32xf32>
    %15 = vector.broadcast %14 : vector<1x32xf32> to vector<128x32xf32>
    %16 = arith.addf %13, %15 : vector<128x32xf32>
    %c0_16 = arith.constant 0 : index
    %c0_17 = arith.constant 0 : index
    %17 = vector.load %arg8[%c0_16, %c0_17] : memref<128x32xf32, #tpu.memory_space<vmem>>, vector<128x32xf32>
    tpu.vector_store %arg8[%c0_16, %c0_17], %16 {strides = array<i32>} : memref<128x32xf32, #tpu.memory_space<vmem>>, vector<128x32xf32>,
    return
  }
  func.func @transform_0(%arg0: i32) -> (i32, i32) {
    %c0_i32 = arith.constant 0 : i32
    %c0_i32_0 = arith.constant 0 : i32
    return %arg0, %c0_i32 : i32, i32
  }
  func.func @transform_1(%arg0: i32) -> (i32, i32) {
    %c0_i32 = arith.constant 0 : i32
    %c0_i32_0 = arith.constant 0 : i32
    return %arg0, %c0_i32 : i32, i32
  }
  func.func @transform_2(%arg0: i32) -> (i32, i32) {
    %c0_i32 = arith.constant 0 : i32
    %c0_i32_0 = arith.constant 0 : i32
    %c0_i32_1 = arith.constant 0 : i32
    return %c0_i32, %c0_i32_0 : i32, i32
  }
  func.func @transform_3(%arg0: i32) -> (i32, i32) {
    %c0_i32 = arith.constant 0 : i32
    %c0_i32_0 = arith.constant 0 : i32
    %c0_i32_1 = arith.constant 0 : i32
    return %c0_i32, %c0_i32_0 : i32, i32
  }
  func.func @transform_4(%arg0: i32) -> (i32, i32) {
    %c0_i32 = arith.constant 0 : i32
    %c0_i32_0 = arith.constant 0 : i32
    %c0_i32_1 = arith.constant 0 : i32
    return %c0_i32, %c0_i32_0 : i32, i32
  }
  func.func @transform_5(%arg0: i32) -> (i32, i32) {
    %c0_i32 = arith.constant 0 : i32
    %c0_i32_0 = arith.constant 0 : i32
    %c0_i32_1 = arith.constant 0 : i32
    return %c0_i32, %c0_i32_0 : i32, i32
  }
  func.func @transform_6(%arg0: i32) -> (i32, i32) {
    %c0_i32 = arith.constant 0 : i32
    %c0_i32_0 = arith.constant 0 : i32
    %c0_i32_1 = arith.constant 0 : i32
    return %c0_i32, %c0_i32_0 : i32, i32
  }
  func.func @transform_7(%arg0: i32) -> (i32, i32) {
    %c0_i32 = arith.constant 0 : i32
    %c0_i32_0 = arith.constant 0 : i32
    return %arg0, %c0_i32 : i32, i32
  }
}

</mosaic_0001>

<bundles_post_ra>
// kernel: tpu_custom_call.1
= control target key start
LH: loop header
LB: loop body
LE: loop exit
PB: predicated region body
PF: predicated region fallthrough
CT: control target
= control target key end

     0   :  { %s952_s24 = smov 0   ;;  %s1167_s0 = inlined_call_operand.vmem [shape: f32[256,32], index: 0, kind: input, shape index: {}]   ;;  %s1168_s1 = inlined_call_operand.vmem [shape: f32[256,32], index: 1, kind: input, shape index: {}]   ;;  %s1169_s2 = inlined_call_operand.vmem [shape: f32[32,64], index: 2, kind: input, shape index: {}]   ;;  %s1170_s3 = inlined_call_operand.vmem [shape: f32[32,64], index: 3, kind: input, shape index: {}]   ;;  %s1171_s4 = inlined_call_operand.vmem [shape: f32[1,64], index: 4, kind: input, shape index: {}]   ;;  %s1172_s5 = inlined_call_operand.vmem [shape: f32[64,32], index: 5, kind: input, shape index: {}]   ;;  %s1173_s6 = inlined_call_operand.vmem [shape: f32[1,32], index: 6, kind: input, shape index: {}]   ;;  %s1174_s7 = inlined_call_operand.vmem [shape: f32[256,32], index: 7, kind: output, shape index: {}]  }
   0x1 LB: > { %s817_s25 = sadd.s32 4294967295, %s910_s24   ;;  %p821_p0 = scmp.ge.s32.totalorder %s910_s24, 1  ;;  %s910_s24 = sphi %s952_s24, %s17_s24  }
   0x2   : > { %p249_p1 = scmp.lt.s32.totalorder %s910_s24, 3 }
   0x4   : > { %p250_p2 = pnand %p821_p0, %p249_p1 }
   0x5   : > { %s822_s9 = sshll.u32 (!%p250_p2), %s817_s25, 4 }
   0x6   : > { %253 = sbr.rel (%p250_p2) target bundleno = 407 (0x197), region = 48  ;;  %p287_p3 = scmp.lt.s32.totalorder (!%p250_p2), %s822_s9, 31 }
   0xb   : > { %v343_v0 = vld [vmem:[%s1170_s3 + $0x18] sm:$0xff]  ;;  %v342_v2 = vld [vmem:[%s1170_s3 + $0x10] sm:$0xff]  ;;  %v341_v4 = vld [vmem:[%s1170_s3 + $0x8] sm:$0xff]  ;;  %s1176_s9 = smov (!%p287_p3, %s822_s9), 31  ;;  %vm344_vm0 = vcmask 261120   ;;  %vm619_vm1 = vcmask 523264  }
   0xc   : > { %v323_v1 = vld [vmem:[%s1169_s2 + $0x18] sm:$0xff]  ;;  %405 = vmatpush.msra.mxu0 %v343_v0  ;;  %v322_v3 = vld [vmem:[%s1169_s2 + $0x10] sm:$0xff]  ;;  %v321_v5 = vld [vmem:[%s1169_s2 + $0x8] sm:$0xff]  ;;  %878 = vmatpush.msra.mxu3 %v343_v0  ;;  %s984_s20 = sshll.u32 %s1176_s9, 3 }
   0xd   : > { %518 = vmatpush.msra.mxu1 %v323_v1  ;;  %v340_v6 = vld [vmem:[%s1170_s3] sm:$0xff]  ;;  %s990_s23 = scalar_lea.vmem %s1168_s1, %s984_s20  ;;  %s996_s27 = scalar_lea.vmem %s1167_s0, %s984_s20  ;;  %v614_v32 = vld [vmem:[%s1172_s5 + $0x38] sm:$0xff]  ;;  %v613_v33 = vld [vmem:[%s1172_s5 + $0x30] sm:$0xff] }
   0xe   : > { %406 = vmatpush.msra.mxu0 %v342_v2  ;;  %v320_v7 = vld [vmem:[%s1169_s2] sm:$0xff]  ;;  %879 = vmatpush.msra.mxu3 %v342_v2  ;;  %v325_v10 = vld [vmem:[%s990_s23 + $0x8] sm:$0xff]  ;;  %v326_v12 = vld [vmem:[%s990_s23 + $0x10] sm:$0xff]  ;;  %s1130_s29 = scalar_lea.vmem %s1174_s7, %s984_s20 }
   0xf   : > { %519 = vmatpush.msra.mxu1 %v322_v3  ;;  %v324_v8 = vld [vmem:[%s990_s23] sm:$0xff]  ;;  %v305_v11 = vld [vmem:[%s996_s27 + $0x8] sm:$0xff]  ;;  %v306_v13 = vld [vmem:[%s996_s27 + $0x10] sm:$0xff]  ;;  %676 = vmatpush.msra.mxu2 %v614_v32 }
  0x10   : > { %407 = vmatpush.msra.mxu0 %v341_v4  ;;  %880 = vmatpush.msra.mxu3 %v341_v4  ;;  %v304_v9 = vld [vmem:[%s996_s27] sm:$0xff]  ;;  %v337_v14 = vld [vmem:[%s990_s23 + $0x68] sm:$0xff]  ;;  %v327_v15 = vld [vmem:[%s990_s23 + $0x18] sm:$0xff] }
  0x11   : > { %520 = vmatpush.msra.mxu1 %v321_v5  ;;  %v307_v16 = vld [vmem:[%s996_s27 + $0x18] sm:$0xff]  ;;  %v338_v17 = vld [vmem:[%s990_s23 + $0x70] sm:$0xff]  ;;  %v328_v18 = vld [vmem:[%s990_s23 + $0x20] sm:$0xff]  ;;  %677 = vmatpush.msra.mxu2 %v613_v33 }
  0x12   : > { %408 = vmatpush.msra.mxu0 %v340_v6  ;;  %881 = vmatpush.msra.mxu3 %v340_v6  ;;  %v308_v19 = vld [vmem:[%s996_s27 + $0x20] sm:$0xff]  ;;  %v339_v20 = vld [vmem:[%s990_s23 + $0x78] sm:$0xff]  ;;  %v329_v21 = vld [vmem:[%s990_s23 + $0x28] sm:$0xff] }
  0x13   : > { %521 = vmatpush.msra.mxu1 %v320_v7  ;;  %828 = vmatmul.msk.f32.vlgmr.msra.gmra.mxu0 %vm344_vm0, %v324_v8  ;;  %v309_v22 = vld [vmem:[%s996_s27 + $0x28] sm:$0xff]  ;;  %v330_v24 = vld [vmem:[%s990_s23 + $0x30] sm:$0xff]  ;;  %v331_v27 = vld [vmem:[%s990_s23 + $0x38] sm:$0xff] }
  0x14   : > { %844 = vmatmul.msk.f32.vlgmr.msra.gmra.mxu1 %vm344_vm0, %v304_v9  ;;  %882 = vmatpush.msrb.mxu3 %v323_v1  ;;  %v317_v23 = vld [vmem:[%s996_s27 + $0x68] sm:$0xff]  ;;  %v310_v25 = vld [vmem:[%s996_s27 + $0x30] sm:$0xff]  ;;  %v311_v28 = vld [vmem:[%s996_s27 + $0x38] sm:$0xff] }
  0x15   : > { %841 = vmatmul.msk.f32.vlgmr.msra.gmra.mxu3 %vm344_vm0, %v337_v14  ;;  %v318_v26 = vld [vmem:[%s996_s27 + $0x70] sm:$0xff]  ;;  %v319_v29 = vld [vmem:[%s996_s27 + $0x78] sm:$0xff]  ;;  %v332_v30 = vld [vmem:[%s990_s23 + $0x40] sm:$0xff] }
  0x16   : > { %883 = vmatpush.msrb.mxu3 %v322_v3  ;;  %v312_v31 = vld [vmem:[%s996_s27 + $0x40] sm:$0xff]  ;;  %v612_v34 = vld [vmem:[%s1172_s5 + $0x28] sm:$0xff]  ;;  %v334_v38 = vld [vmem:[%s990_s23 + $0x50] sm:$0xff] }
  0x17   : > { %v611_v35 = vld [vmem:[%s1172_s5 + $0x20] sm:$0xff]  ;;  %v333_v36 = vld [vmem:[%s990_s23 + $0x48] sm:$0xff]  ;;  %678 = vmatpush.msra.mxu2 %v612_v34  ;;  %v314_v39 = vld [vmem:[%s996_s27 + $0x50] sm:$0xff] }
  0x18   : > { %884 = vmatpush.msrb.mxu3 %v321_v5  ;;  %v313_v37 = vld [vmem:[%s996_s27 + $0x48] sm:$0xff]  ;;  %v335_v40 = vld [vmem:[%s990_s23 + $0x58] sm:$0xff]  ;;  %v336_v43 = vld [vmem:[%s990_s23 + $0x60] sm:$0xff] }
  0x19   : > { %679 = vmatpush.msra.mxu2 %v611_v35  ;;  %v315_v41 = vld [vmem:[%s996_s27 + $0x58] sm:$0xff]  ;;  %v316_v44 = vld [vmem:[%s996_s27 + $0x60] sm:$0xff]  ;;  %v609_v45 = vld [vmem:[%s1172_s5 + $0x10] sm:$0xff] }
  0x1a   : > { %885 = vmatpush.msrb.mxu3 %v320_v7  ;;  %v610_v42 = vld [vmem:[%s1172_s5 + $0x18] sm:$0xff]  ;;  %v608_v46 = vld [vmem:[%s1172_s5 + $0x8] sm:$0xff]  ;;  %v607_v47 = vld [vmem:[%s1172_s5] sm:$0xff] }
  0x1b   : > { %829 = vmatmul.msk.f32.gmra.mxu0 %vm344_vm0, %v325_v10  ;;  %680 = vmatpush.msra.mxu2 %v610_v42  ;;  %v1089_v48 = vld [vmem:[%s1171_s4] ss:$0 sm:$0xff] }
  0x1c   : > { %845 = vmatmul.msk.f32.gmra.mxu1 %vm344_vm0, %v305_v11  ;;  %886 = vmatpush.msra.mxu3 %v614_v32 }
  0x1d   : > { %842 = vmatmul.msk.f32.gmra.mxu3 %vm344_vm0, %v338_v17  ;;  %681 = vmatpush.msra.mxu2 %v609_v45 }
  0x1e   : > { %887 = vmatpush.msra.mxu3 %v613_v33 }
  0x1f   : > { %682 = vmatpush.msra.mxu2 %v608_v46 }
  0x20   : > { %888 = vmatpush.msra.mxu3 %v612_v34 }
  0x21   : > { %683 = vmatpush.msra.mxu2 %v607_v47 }
  0x22   : > { %889 = vmatpush.msra.mxu3 %v611_v35 }
  0x23   : > { %830 = vmatmul.msk.f32.gmra.mxu0 %vm344_vm0, %v326_v12 }
  0x24   : > { %846 = vmatmul.msk.f32.gmra.mxu1 %vm344_vm0, %v306_v13  ;;  %890 = vmatpush.msra.mxu3 %v610_v42 }
  0x25   : > { %843 = vmatmul.msk.f32.gmra.mxu3 %vm344_vm0, %v339_v20 }
  0x26   : > { %891 = vmatpush.msra.mxu3 %v609_v45 }
  0x28   : > { %892 = vmatpush.msra.mxu3 %v608_v46 }
  0x2a   : > { %893 = vmatpush.msra.mxu3 %v607_v47 }
  0x2b   : > { %831 = vmatmul.msk.f32.gmra.mxu0 %vm344_vm0, %v327_v15 }
  0x2c   : > { %847 = vmatmul.msk.f32.gmra.mxu1 %vm344_vm0, %v307_v16 }
  0x2d   : > { %857 = vmatmul.msk.f32.vlgmr.msrb.gmra.mxu3 %vm344_vm0, %v317_v23 }
  0x33   : > { %832 = vmatmul.msk.f32.gmra.mxu0 %vm344_vm0, %v328_v18 }
  0x34   : > { %848 = vmatmul.msk.f32.gmra.mxu1 %vm344_vm0, %v308_v19 }
  0x35   : > { %858 = vmatmul.msk.f32.gmra.mxu3 %vm344_vm0, %v318_v26 }
  0x3b   : > { %833 = vmatmul.msk.f32.gmra.mxu0 %vm344_vm0, %v329_v21 }
  0x3c   : > { %849 = vmatmul.msk.f32.gmra.mxu1 %vm344_vm0, %v309_v22 }
  0x3d   : > { %859 = vmatmul.msk.f32.gmra.mxu3 %vm344_vm0, %v319_v29 }
  0x43   : > { %834 = vmatmul.msk.f32.gmra.mxu0 %vm344_vm0, %v330_v24 }
  0x44   : > { %850 = vmatmul.msk.f32.gmra.mxu1 %vm344_vm0, %v310_v25 }
  0x4b   : > { %835 = vmatmul.msk.f32.gmra.mxu0 %vm344_vm0, %v331_v27 }
  0x4c   : > { %851 = vmatmul.msk.f32.gmra.mxu1 %vm344_vm0, %v311_v28 }
  0x53   : > { %836 = vmatmul.msk.f32.gmra.mxu0 %vm344_vm0, %v332_v30 }
  0x54   : > { %852 = vmatmul.msk.f32.gmra.mxu1 %vm344_vm0, %v312_v31 }
  0x5b   : > { %837 = vmatmul.msk.f32.gmra.mxu0 %vm344_vm0, %v333_v36 }
  0x5c   : > { %853 = vmatmul.msk.f32.gmra.mxu1 %vm344_vm0, %v313_v37 }
  0x63   : > { %838 = vmatmul.msk.f32.gmra.mxu0 %vm344_vm0, %v334_v38 }
  0x64   : > { %854 = vmatmul.msk.f32.gmra.mxu1 %vm344_vm0, %v314_v39 }
  0x6b   : > { %839 = vmatmul.msk.f32.gmra.mxu0 %vm344_vm0, %v335_v40 }
  0x6c   : > { %855 = vmatmul.msk.f32.gmra.mxu1 %vm344_vm0, %v315_v41 }
  0x73   : > { %840 = vmatmul.msk.f32.gmra.mxu0 %vm344_vm0, %v336_v43 }
  0x74   : > { %856 = vmatmul.msk.f32.gmra.mxu1 %vm344_vm0, %v316_v44 }
  0x90   : > { %v410_v49 = vpop.f32.mrf.mxu0 }
  0x91   : > { %v523_v50 = vpop.f32.mrf.mxu1 }
  0x92   : > { %v524_v51 = vadd.f32 %v523_v50, %v410_v49 }
  0x94   : > { %v575_v52 = vadd.f32 %v1089_v48, %v524_v51 }
  0x96   : > { %v591_v53 = vmax.f32 %v575_v52, 0.0 }
  0x98   : > { %860 = vmatmul.msk.f32.vlgmr.msra.gmra.mxu2 %vm619_vm1, %v591_v53  ;;  %v413_v54 = vpop.f32.mrf.mxu0  ;;  %v449_v25 = vpop.f32.mrf.mxu3 }
  0x99   : > { %v526_v55 = vpop.f32.mrf.mxu1 }
  0x9a   : > { %v527_v56 = vadd.f32 %v526_v55, %v413_v54 }
  0x9c   : > { %v576_v57 = vadd.f32 %v1089_v48, %v527_v56 }
  0x9e   : > { %v592_v58 = vmax.f32 %v576_v57, 0.0 }
  0xa0   : > { %861 = vmatmul.msk.f32.gmra.mxu2 %vm619_vm1, %v592_v58  ;;  %v416_v59 = vpop.f32.mrf.mxu0  ;;  %v452_v34 = vpop.f32.mrf.mxu3 }
  0xa1   : > { %v529_v60 = vpop.f32.mrf.mxu1 }
  0xa2   : > { %v530_v61 = vadd.f32 %v529_v60, %v416_v59 }
  0xa4   : > { %v577_v62 = vadd.f32 %v1089_v48, %v530_v61 }
  0xa6   : > { %v593_v63 = vmax.f32 %v577_v62, 0.0 }
  0xa8   : > { %862 = vmatmul.msk.f32.gmra.mxu2 %vm619_vm1, %v593_v63  ;;  %v419_v0 = vpop.f32.mrf.mxu0  ;;  %v455_v41 = vpop.f32.mrf.mxu3 }
  0xa9   : > { %v532_v1 = vpop.f32.mrf.mxu1 }
  0xaa   : > { %v533_v2 = vadd.f32 %v532_v1, %v419_v0 }
  0xac   : > { %v578_v3 = vadd.f32 %v1089_v48, %v533_v2  ;;  %v903_v2 = vld [vmem:[%s1173_s6] ss:$0 sm:$0xff] }
  0xae   : > { %v594_v4 = vmax.f32 %v578_v3, 0.0 }
  0xb0   : > { %863 = vmatmul.msk.f32.gmra.mxu2 %vm619_vm1, %v594_v4  ;;  %v422_v5 = vpop.f32.mrf.mxu0  ;;  %v562_v49 = vpop.f32.mrf.mxu3 }
  0xb1   : > { %v535_v6 = vpop.f32.mrf.mxu1  ;;  %v563_v54 = vadd.f32 %v562_v49, %v449_v25 }
  0xb2   : > { %v536_v7 = vadd.f32 %v535_v6, %v422_v5 }
  0xb3   : > { %v588_v57 = vadd.f32 %v1089_v48, %v563_v54 }
  0xb4   : > { %v579_v8 = vadd.f32 %v1089_v48, %v536_v7 }
  0xb5   : > { %v604_v58 = vmax.f32 %v588_v57, 0.0 }
  0xb6   : > { %v595_v9 = vmax.f32 %v579_v8, 0.0 }
  0xb8   : > { %864 = vmatmul.msk.f32.gmra.mxu2 %vm619_vm1, %v595_v9  ;;  %v425_v10 = vpop.f32.mrf.mxu0  ;;  %v565_v56 = vpop.f32.mrf.mxu3 }
  0xb9   : > { %v538_v11 = vpop.f32.mrf.mxu1  ;;  %v566_v59 = vadd.f32 %v565_v56, %v452_v34 }
  0xba   : > { %v539_v12 = vadd.f32 %v538_v11, %v425_v10 }
  0xbb   : > { %v589_v60 = vadd.f32 %v1089_v48, %v566_v59 }
  0xbc   : > { %v580_v13 = vadd.f32 %v1089_v48, %v539_v12 }
  0xbd   : > { %v605_v62 = vmax.f32 %v589_v60, 0.0 }
  0xbe   : > { %v596_v14 = vmax.f32 %v580_v13, 0.0 }
  0xc0   : > { %865 = vmatmul.msk.f32.gmra.mxu2 %vm619_vm1, %v596_v14  ;;  %v428_v15 = vpop.f32.mrf.mxu0  ;;  %v568_v61 = vpop.f32.mrf.mxu3 }
  0xc1   : > { %v541_v16 = vpop.f32.mrf.mxu1  ;;  %v569_v63 = vadd.f32 %v568_v61, %v455_v41 }
  0xc2   : > { %v542_v17 = vadd.f32 %v541_v16, %v428_v15 }
  0xc3   : > { %v590_v0 = vadd.f32 %v1089_v48, %v569_v63 }
  0xc4   : > { %v581_v18 = vadd.f32 %v1089_v48, %v542_v17 }
  0xc5   : > { %v606_v1 = vmax.f32 %v590_v0, 0.0 }
  0xc6   : > { %v597_v19 = vmax.f32 %v581_v18, 0.0 }
  0xc8   : > { %866 = vmatmul.msk.f32.gmra.mxu2 %vm619_vm1, %v597_v19  ;;  %v431_v20 = vpop.f32.mrf.mxu0 }
  0xc9   : > { %v544_v21 = vpop.f32.mrf.mxu1 }
  0xca   : > { %v545_v22 = vadd.f32 %v544_v21, %v431_v20 }
  0xcc   : > { %v582_v23 = vadd.f32 %v1089_v48, %v545_v22 }
  0xce   : > { %v598_v24 = vmax.f32 %v582_v23, 0.0 }
  0xd0   : > { %867 = vmatmul.msk.f32.gmra.mxu2 %vm619_vm1, %v598_v24  ;;  %v434_v26 = vpop.f32.mrf.mxu0 }
  0xd1   : > { %v547_v27 = vpop.f32.mrf.mxu1 }
  0xd2   : > { %v548_v28 = vadd.f32 %v547_v27, %v434_v26 }
  0xd4   : > { %v583_v29 = vadd.f32 %v1089_v48, %v548_v28 }
  0xd6   : > { %v599_v30 = vmax.f32 %v583_v29, 0.0 }
  0xd8   : > { %868 = vmatmul.msk.f32.gmra.mxu2 %vm619_vm1, %v599_v30  ;;  %v437_v31 = vpop.f32.mrf.mxu0 }
  0xd9   : > { %v550_v32 = vpop.f32.mrf.mxu1 }
  0xda   : > { %v551_v33 = vadd.f32 %v550_v32, %v437_v31 }
  0xdc   : > { %v584_v35 = vadd.f32 %v1089_v48, %v551_v33 }
  0xde   : > { %v600_v36 = vmax.f32 %v584_v35, 0.0 }
  0xe0   : > { %869 = vmatmul.msk.f32.gmra.mxu2 %vm619_vm1, %v600_v36  ;;  %v440_v37 = vpop.f32.mrf.mxu0 }
  0xe1   : > { %v553_v38 = vpop.f32.mrf.mxu1 }
  0xe2   : > { %v554_v39 = vadd.f32 %v553_v38, %v440_v37 }
  0xe4   : > { %v585_v40 = vadd.f32 %v1089_v48, %v554_v39 }
  0xe6   : > { %v601_v42 = vmax.f32 %v585_v40, 0.0 }
  0xe8   : > { %870 = vmatmul.msk.f32.gmra.mxu2 %vm619_vm1, %v601_v42  ;;  %v443_v43 = vpop.f32.mrf.mxu0 }
  0xe9   : > { %v556_v44 = vpop.f32.mrf.mxu1 }
  0xea   : > { %v557_v45 = vadd.f32 %v556_v44, %v443_v43 }
  0xec   : > { %v586_v46 = vadd.f32 %v1089_v48, %v557_v45 }
  0xee   : > { %v602_v47 = vmax.f32 %v586_v46, 0.0 }
  0xf0   : > { %871 = vmatmul.msk.f32.gmra.mxu2 %vm619_vm1, %v602_v47  ;;  %v446_v50 = vpop.f32.mrf.mxu0 }
  0xf1   : > { %v559_v51 = vpop.f32.mrf.mxu1 }
  0xf2   : > { %v560_v52 = vadd.f32 %v559_v51, %v446_v50 }
  0xf4   : > { %v587_v53 = vadd.f32 %v1089_v48, %v560_v52 }
  0xf6   : > { %v603_v55 = vmax.f32 %v587_v53, 0.0 }
  0xf8   : > { %872 = vmatmul.msk.f32.vlgmr.msra.gmra.mxu3 %vm619_vm1, %v603_v55 }
 0x100   : > { %873 = vmatmul.msk.f32.gmra.mxu3 %vm619_vm1, %v604_v58 }
 0x108   : > { %874 = vmatmul.msk.f32.gmra.mxu3 %vm619_vm1, %v605_v62 }
 0x110   : > { %875 = vmatmul.msk.f32.gmra.mxu3 %vm619_vm1, %v606_v1 }
 0x11b   : > { %v685_v3 = vpop.f32.mrf.mxu2 }
 0x11c   : > { %v686_v4 = vadd.f32 %v903_v2, %v685_v3 }
 0x11e   : > { %733 = vst.msk [vmem:[%s1130_s29] sm:$0xff] %vm344_vm0, %v686_v4 }
 0x123   : > { %v688_v48 = vpop.f32.mrf.mxu2 }
 0x124   : > { %v689_v5 = vadd.f32 %v903_v2, %v688_v48 }
 0x126   : > { %734 = vst.msk [vmem:[%s1130_s29 + $0x8] sm:$0xff] %vm344_vm0, %v689_v5 }
 0x12b   : > { %v691_v6 = vpop.f32.mrf.mxu2 }
 0x12c   : > { %v692_v7 = vadd.f32 %v903_v2, %v691_v6 }
 0x12e   : > { %735 = vst.msk [vmem:[%s1130_s29 + $0x10] sm:$0xff] %vm344_vm0, %v692_v7 }
 0x133   : > { %v694_v8 = vpop.f32.mrf.mxu2 }
 0x134   : > { %v695_v9 = vadd.f32 %v903_v2, %v694_v8 }
 0x136   : > { %736 = vst.msk [vmem:[%s1130_s29 + $0x18] sm:$0xff] %vm344_vm0, %v695_v9 }
 0x13b   : > { %v697_v10 = vpop.f32.mrf.mxu2 }
 0x13c   : > { %v698_v11 = vadd.f32 %v903_v2, %v697_v10 }
 0x13e   : > { %737 = vst.msk [vmem:[%s1130_s29 + $0x20] sm:$0xff] %vm344_vm0, %v698_v11 }
 0x143   : > { %v700_v12 = vpop.f32.mrf.mxu2 }
 0x144   : > { %v701_v13 = vadd.f32 %v903_v2, %v700_v12 }
 0x146   : > { %738 = vst.msk [vmem:[%s1130_s29 + $0x28] sm:$0xff] %vm344_vm0, %v701_v13 }
 0x14b   : > { %v703_v14 = vpop.f32.mrf.mxu2 }
 0x14c   : > { %v704_v15 = vadd.f32 %v903_v2, %v703_v14 }
 0x14e   : > { %739 = vst.msk [vmem:[%s1130_s29 + $0x30] sm:$0xff] %vm344_vm0, %v704_v15 }
 0x153   : > { %v706_v16 = vpop.f32.mrf.mxu2 }
 0x154   : > { %v707_v17 = vadd.f32 %v903_v2, %v706_v16 }
 0x156   : > { %740 = vst.msk [vmem:[%s1130_s29 + $0x38] sm:$0xff] %vm344_vm0, %v707_v17 }
 0x15b   : > { %v709_v18 = vpop.f32.mrf.mxu2 }
 0x15c   : > { %v710_v19 = vadd.f32 %v903_v2, %v709_v18 }
 0x15e   : > { %741 = vst.msk [vmem:[%s1130_s29 + $0x40] sm:$0xff] %vm344_vm0, %v710_v19 }
 0x163   : > { %v712_v20 = vpop.f32.mrf.mxu2 }
 0x164   : > { %v713_v21 = vadd.f32 %v903_v2, %v712_v20 }
 0x166   : > { %742 = vst.msk [vmem:[%s1130_s29 + $0x48] sm:$0xff] %vm344_vm0, %v713_v21 }
 0x16b   : > { %v715_v22 = vpop.f32.mrf.mxu2 }
 0x16c   : > { %v716_v23 = vadd.f32 %v903_v2, %v715_v22 }
 0x16e   : > { %743 = vst.msk [vmem:[%s1130_s29 + $0x50] sm:$0xff] %vm344_vm0, %v716_v23 }
 0x173   : > { %v718_v24 = vpop.f32.mrf.mxu2 }
 0x174   : > { %v719_v25 = vadd.f32 %v903_v2, %v718_v24 }
 0x176   : > { %744 = vst.msk [vmem:[%s1130_s29 + $0x58] sm:$0xff] %vm344_vm0, %v719_v25 }
 0x17b   : > { %v721_v26 = vpop.f32.mrf.mxu3 }
 0x17c   : > { %v722_v27 = vadd.f32 %v903_v2, %v721_v26 }
 0x17e   : > { %745 = vst.msk [vmem:[%s1130_s29 + $0x60] sm:$0xff] %vm344_vm0, %v722_v27 }
 0x183   : > { %v724_v28 = vpop.f32.mrf.mxu3 }
 0x184   : > { %v725_v29 = vadd.f32 %v903_v2, %v724_v28 }
 0x186   : > { %746 = vst.msk [vmem:[%s1130_s29 + $0x68] sm:$0xff] %vm344_vm0, %v725_v29 }
 0x18b   : > { %v727_v30 = vpop.f32.mrf.mxu3 }
 0x18c   : > { %v728_v31 = vadd.f32 %v903_v2, %v727_v30 }
 0x18e   : > { %747 = vst.msk [vmem:[%s1130_s29 + $0x70] sm:$0xff] %vm344_vm0, %v728_v31 }
 0x193   : > { %v730_v32 = vpop.f32.mrf.mxu3 }
 0x194   : > { %v731_v33 = vadd.f32 %v903_v2, %v730_v32 }
 0x196   : > { %748 = vst.msk [vmem:[%s1130_s29 + $0x78] sm:$0xff] %vm344_vm0, %v731_v33 }
 0x197 PF: > { %s17_s24 = sadd.s32 1, %s910_s24  }
 0x198   : > { %p14_p4 = scmp.ge.s32.totalorder %s17_s24, 4  }
 0x19a   :  { %16 = sbr.rel (!%p14_p4) target bundleno = 1 (0x1), region = 81 }

</bundles_post_ra>
